<compile_context>
chip_gen: v7x
topology: tpu7x:2x2x1
jax: 0.10.0
libtpu: 0.0.40
codegen_flags: <defaults>
</compile_context>

<pallas_src>
import jax
import jax.numpy as jnp
from jax.experimental import pallas as pl
from jax.experimental.pallas import tpu as pltpu

_LANES = 128  # vreg lane width; points are packed along this axis


def _normalize_kernel(params_ref, x_ref, o_ref):
    """o = (x - lo) * scale for one (R, 128) tile of one coordinate axis.

    params_ref: (2*d,) f32 in SMEM, laid out [lo_0, scale_0, lo_1, scale_1, ...]
    x_ref, o_ref: (R, 128) tiles in VMEM (R a multiple of 8 or the full extent).
    """
    di = pl.program_id(0)          # which coordinate axis this grid step handles
    lo = params_ref[2 * di]
    scale = params_ref[2 * di + 1]
    o_ref[...] = (x_ref[...] - lo) * scale


def _vmem_capacity_bytes():
    try:
        return pltpu.get_tpu_info().vmem_capacity_bytes
    except Exception:
        return 64 << 20            # conservative fallback (v7x per-core size)


def _pick_block_rows(n_rows, block_rows):
    """Rows of 128 f32 lanes per block; sized from physical VMEM."""
    if block_rows is None:
        vmem = _vmem_capacity_bytes()
        # in + out, double-buffered -> 4 live VMEM buffers.  Cap each buffer at
        # min(8 MiB, VMEM/16): ~32 MiB live on 128 MiB parts (v5e/v6e), ~16 MiB
        # live on v7x's 64 MiB -- always under the scoped limit set below.
        per_buf_bytes = min(8 << 20, vmem // 16)
        block_rows = per_buf_bytes // (_LANES * 4)
    if block_rows >= n_rows:
        return n_rows              # single full-extent block: always layout-legal
    return max(8, (block_rows // 8) * 8)   # multiple of 8 sublanes


def base_net_normalize_dn(x_dn, bound, *, block_rows=None):
    """World -> unit-grid normalization, coordinate-major (d, N) layout.

    x_dn:  (d, N) float32 world-frame positions (points on the lane axis).
    bound: (d, 2) float32, bound[:, 0] = lower, bound[:, 1] = upper.
    returns (d, N) normalized positions (in [0, 1] for points inside bound).
    """
    d, n = x_dn.shape
    assert d in (2, 3)
    assert bound.shape == (d, 2)

    bound = bound.astype(x_dn.dtype)
    lo = bound[:, 0]
    scale = 1.0 / (bound[:, 1] - lo)          # hi == lo -> inf (matches reference)
    params = jnp.stack([lo, scale], axis=1).reshape(2 * d)   # (2*d,) -> SMEM

    # Pack points densely onto lanes: (d, N) -> (d, N/128, 128) (free reshape,
    # row-major).  Ragged N is padded to a lane multiple and sliced back;
    # callers should prefer N % 128 == 0 to avoid the extra pad/slice copy.
    pad = (-n) % _LANES
    x_in = jnp.pad(x_dn, ((0, 0), (0, pad))) if pad else x_dn
    n_full = n + pad
    n_rows = n_full // _LANES
    x3 = x_in.reshape(d, n_rows, _LANES)

    br = _pick_block_rows(n_rows, block_rows)
    grid = (d, pl.cdiv(n_rows, br))           # partial last row-block is fine

    vmem_limit = min(_vmem_capacity_bytes() // 2, 64 << 20)

    out3 = pl.pallas_call(
        _normalize_kernel,
        out_shape=jax.ShapeDtypeStruct((d, n_rows, _LANES), x_dn.dtype),
        grid_spec=pl.GridSpec(
            grid=grid,
            in_specs=[
                # (2*d,) scalar table, whole array resident in SMEM.
                pl.BlockSpec(memory_space=pltpu.MemorySpace.SMEM),
                # Dense (R, 128) point tile of coordinate axis di.
                pl.BlockSpec((pl.Squeezed(), br, _LANES),
                             lambda di, ni: (di, ni, 0)),
            ],
            out_specs=pl.BlockSpec((pl.Squeezed(), br, _LANES),
                                   lambda di, ni: (di, ni, 0)),
        ),
        compiler_params=pltpu.CompilerParams(
            dimension_semantics=("parallel", "parallel"),  # megacore on v7x
            vmem_limit_bytes=vmem_limit,
        ),
    )(params, x3)

    out = out3.reshape(d, n_full)
    return out[:, :n] if pad else out


def base_net_forward(x_nd, bound):
    """(N, d) convenience path matching the PyTorch forward signature.

    Intentionally NOT a Pallas kernel: an (N, 3) block uses 3/128 of each
    vreg lane, and a transpose round-trip to the lane-dense layout would
    triple HBM traffic.  Plain jnp (which XLA fuses into neighbouring ops)
    is strictly better here; callers that can supply (d, N) natively should
    use base_net_normalize_dn, or better, fuse this FMA into the downstream
    grid-sampling kernel.
    """
    n, d = x_nd.shape
    assert d in (2, 3)
    assert bound.shape == (d, 2)
    bound = bound.astype(x_nd.dtype)
    lo = bound[:, 0]
    return (x_nd - lo[None, :]) / (bound[:, 1] - lo)[None, :]


if __name__ == "__main__":
    key = jax.random.PRNGKey(0)
    d = 3
    # Deterministic "cfg": spatial_dim = 3, grid bound per axis (self.bound).
    bound = jnp.array(
        [[-1.0, 1.0],
         [-2.0, 2.0],
         [0.0, 4.0]], dtype=jnp.float32)                     # (d, 2)
    lo_c = bound[:, 0][:, None]
    hi_c = bound[:, 1][:, None]

    # 1) Lane-dense (d, N) path, N a lane multiple (single full-extent block).
    n = 4096
    x_dn = jax.random.uniform(key, (d, n), dtype=jnp.float32,
                              minval=-3.0, maxval=5.0)
    out = jax.block_until_ready(base_net_normalize_dn(x_dn, bound))
    ref = (x_dn - lo_c) / (hi_c - lo_c)
    assert out.shape == (d, n)
    assert jnp.allclose(out, ref, atol=1e-5, rtol=1e-5)

    # 2) Multi-block grid: block_rows=8 -> grid (3, 4), exercises pipelining.
    out2 = jax.block_until_ready(
        base_net_normalize_dn(x_dn, bound, block_rows=8))
    assert jnp.allclose(out2, ref, atol=1e-5, rtol=1e-5)

    # 3) Ragged N (not a multiple of 128): exercises the pad + slice path.
    n3 = 1000
    x3 = jax.random.uniform(jax.random.PRNGKey(0), (d, n3), dtype=jnp.float32,
                            minval=-3.0, maxval=5.0)
    out3 = jax.block_until_ready(base_net_normalize_dn(x3, bound))
    ref3 = (x3 - lo_c) / (hi_c - lo_c)
    assert out3.shape == (d, n3)
    assert jnp.allclose(out3, ref3, atol=1e-5, rtol=1e-5)

    # 4) (N, d) convenience path (plain jnp by design; see docstring).
    x_nd = jnp.transpose(x_dn, (1, 0))
    out_nd = jax.block_until_ready(base_net_forward(x_nd, bound))
    ref_nd = (x_nd - bound[:, 0][None, :]) / (bound[:, 1] - bound[:, 0])[None, :]
    assert jnp.allclose(out_nd, ref_nd, atol=1e-5, rtol=1e-5)

    print("KERNEL_OK")
</pallas_src>

<mosaic_0001>
module attributes {stable_mosaic.version = 11 : i64} {
  func.func @_normalize_kernel(%arg0: i32, %arg1: i32, %arg2: memref<6xf32, #tpu.memory_space<smem>>, %arg3: memref<1x32x128xf32, #tpu.memory_space<vmem>>, %arg4: memref<1x32x128xf32, #tpu.memory_space<vmem>>) attributes {dimension_semantics = [#tpu.dimension_semantics<parallel>, #tpu.dimension_semantics<parallel>], iteration_bounds = array<i64: 3, 1>, scalar_prefetch = 0 : i64, scratch_operands = 0 : i64, tpu.core_type = #tpu.core_type<tc>, window_params = [{transform_indices = @transform_0, window_bounds = array<i64: 6>}, {transform_indices = @transform_1, window_bounds = array<i64: 1, 32, 128>}, {transform_indices = @transform_2, window_bounds = array<i64: 1, 32, 128>}]} {
    %c2_i32 = arith.constant 2 : i32
    %0 = arith.muli %c2_i32, %arg0 : i32
    %1 = arith.index_cast %0 : i32 to index
    %2 = memref.load %arg2[%1] : memref<6xf32, #tpu.memory_space<smem>>
    %c2_i32_0 = arith.constant 2 : i32
    %3 = arith.muli %c2_i32_0, %arg0 : i32
    %c1_i32 = arith.constant 1 : i32
    %4 = arith.addi %3, %c1_i32 : i32
    %5 = arith.index_cast %4 : i32 to index
    %6 = memref.load %arg2[%5] : memref<6xf32, #tpu.memory_space<smem>>
    %c0 = arith.constant 0 : index
    %c0_1 = arith.constant 0 : index
    %c0_2 = arith.constant 0 : index
    %7 = vector.load %arg3[%c0, %c0_1, %c0_2] : memref<1x32x128xf32, #tpu.memory_space<vmem>>, vector<1x32x128xf32>
    %8 = vector.shape_cast %7 : vector<1x32x128xf32> to vector<32x128xf32>
    %9 = vector.broadcast %2 : f32 to vector<32x128xf32>
    %10 = arith.subf %8, %9 : vector<32x128xf32>
    %11 = vector.broadcast %6 : f32 to vector<32x128xf32>
    %12 = arith.mulf %10, %11 : vector<32x128xf32>
    %c0_3 = arith.constant 0 : index
    %c0_4 = arith.constant 0 : index
    %c0_5 = arith.constant 0 : index
    %13 = vector.load %arg4[%c0_3, %c0_4, %c0_5] : memref<1x32x128xf32, #tpu.memory_space<vmem>>, vector<1x32x128xf32>
    %14 = vector.shape_cast %13 : vector<1x32x128xf32> to vector<32x128xf32>
    %15 = vector.shape_cast %12 : vector<32x128xf32> to vector<1x32x128xf32>
    tpu.vector_store %arg4[%c0_3, %c0_4, %c0_5], %15 {strides = array<i32>} : memref<1x32x128xf32, #tpu.memory_space<vmem>>, vector<1x32x128xf32>,
    return
  }
  func.func @transform_0(%arg0: i32, %arg1: i32) -> i32 {
    %c0_i32 = arith.constant 0 : i32
    %c0_i32_0 = arith.constant 0 : i32
    return %c0_i32 : i32
  }
  func.func @transform_1(%arg0: i32, %arg1: i32) -> (i32, i32, i32) {
    %c0_i32 = arith.constant 0 : i32
    %c0_i32_0 = arith.constant 0 : i32
    return %arg0, %arg1, %c0_i32 : i32, i32, i32
  }
  func.func @transform_2(%arg0: i32, %arg1: i32) -> (i32, i32, i32) {
    %c0_i32 = arith.constant 0 : i32
    %c0_i32_0 = arith.constant 0 : i32
    return %arg0, %arg1, %c0_i32 : i32, i32, i32
  }
}

</mosaic_0001>

<bundles_post_ra>
// kernel: tpu_custom_call.1
= control target key start
LH: loop header
LB: loop body
LE: loop exit
PB: predicated region body
PF: predicated region fallthrough
CT: control target
= control target key end

     0   :  { %7 = vsyncpa [#allocation5], 0  ;;  %s781_s0 = inlined_call_operand.hbm [shape: f32[6], index: 0, kind: input, shape index: {}]   ;;  %s782_s1 = inlined_call_operand.hbm [shape: f32[3,32,128], index: 1, kind: input, shape index: {}]   ;;  %s783_s2 = inlined_call_operand.hbm [shape: f32[3,32,128], index: 2, kind: output, shape index: {}]  }
   0x1   :  { %8 = vsyncpa [#allocation3], 0 }
   0x2   :  { %10 = vsyncpa [#allocation3 + $0x1], 0 }
   0x3   :  { %11 = vsyncpa [#allocation4], 0 }
   0x4   :  { %13 = vsyncpa [#allocation4 + $0x1], 0  ;;  %s581_s9 = smov 0   ;;  %s583_s10 = smov 0  }
   0x5   :  { %s585_s11 = smov 0   ;;  %s587_s12 = smov 0  }
   0x6   :  { %s589_s13 = smov 0   ;;  %s591_s14 = smov 0  }
   0x7 LB: > { %s331_s15 = sadd.s32 4294967295, %s557_s14   ;;  %s332_s16 = sadd.s32 4294967294, %s557_s14   ;;  %s557_s14 = sphi %s591_s14, %s19_s14   ;;  %s553_s13 = sphi %s589_s13, %s802_s13   ;;  %s549_s12 = sphi %s587_s12, %s801_s12   ;;  %s545_s11 = sphi %s585_s11, %s800_s11   ;;  %s541_s10 = sphi %s583_s10, %s799_s10   ;;  %s537_s9 = sphi %s581_s9, %s798_s9  }
   0x8   : > { %s61_s17 = sadd.s32 1, %s545_s11  ;;  %p68_p0 = scmp.ne.s32.totalorder %s545_s11, %s541_s10 }
   0x9   : > { %p69_p1 = scmp.eq.s32.totalorder %s557_s14, 0  ;;  %p74_p2 = scmp.ne.s32.totalorder %s541_s10, %s537_s9 }
   0xa   : > { %p619_p3 = scmp.eq.s32.totalorder %s331_s15, 0  ;;  %p100_p4 = scmp.eq.s32.totalorder %s331_s15, 2 }
   0xb   : > { %p70_p5 = por %p69_p1, %p68_p0  ;;  %p106_p6 = scmp.eq.s32.totalorder %s332_s16, 2 }
   0xc   : > { %s788_s18 = scalar_select %p619_p3, 1, 0 }
   0xd   : > { %p625_p7 = por %p619_p3, %p74_p2  ;;  %p629_p8 = por %p100_p4, %p68_p0 }
   0xe   : > { %p633_p9 = por %p106_p6, %p74_p2  ;;  %p333_p10 = scmp.ge.s32.totalorder %s557_s14, 1 }
   0xf   : > { %s789_s19 = scalar_select %p625_p7, 1, 0 }
  0x10   : > { %s790_s20 = scalar_select %p629_p8, 1, 0 }
  0x11   : > { %s791_s21 = scalar_select %p633_p9, 1, 0 }
  0x12   : > { %p113_p11 = scmp.lt.s32.totalorder %s557_s14, 4  ;;  %p372_p13 = scmp.lt.s32.totalorder %s557_s14, 3 }
  0x13   : > { %s135_s23 = sand.u32 1, %s545_s11   ;;  %s31_s25 = sadd.s32 1, %s553_s13 }
  0x14   : > { %p639_p12 = pnand %p333_p10, %p113_p11  ;;  %p647_p7 = pnand %p372_p13, %p70_p5 }
  0x15   : > { %s336_s26 = sshll.u32 %s135_s23, 5  ;;  %p33_p2 = scmp.ge.s32.totalorder %s31_s25, 3 }
  0x16   : > { %p359_p1 = pneg %p639_p12  ;;  %s428_s29 = scalar_lea.hbm %s781_s0, 16 }
  0x17   : > { %p429_p4 = scmp.ne.s32.totalorder %s781_s0, %s428_s29  ;;  %p435_p5 = scmp.lt.u32.totalorder %s428_s29, %s781_s0 }
  0x18   : > { %p360_p0 = pnand %p359_p1, %p619_p3 }
  0x1a   : > { %p430_p6 = pneg %p360_p0 }
  0x1c   : > { %p431_p10 = pnand %p430_p6, %p429_p4 }
  0x1e   : > { %p432_p11 = pneg %p431_p10 }
  0x20   : > { %p437_p13 = pnand %p435_p5, %p432_p11 }
  0x22   : > { %440 = shalt.err (!%p437_p13)
}
  0x23   : > { %s559_s6 = smov [#allocation2]   ;;  %s804_s25 = smov (%p33_p2, %s31_s25), 0 }
  0x24   : > { %362 = dma.hbm_to_smem (!%p360_p0), %s781_s0, 16, %s559_s6, [#allocation5]  }
  0x25   : > { %s349_s15 = sshll.u32 %s553_s13, 9  ;;  %s56_s16 = ssub.s32 %s553_s13, %s804_s25 }
  0x26   : > { %s674_s29 = scalar_lea.hbm %s782_s1, %s349_s15  ;;  %p59_p1 = scmp.eq.s32.totalorder %s56_s16, 0 }
  0x27   : > { %s139_s30 = scalar_lea.vmem [#allocation6], %s336_s26  ;;  %s683_s5 = scalar_lea.sflag [#allocation3], %s135_s23 }
  0x28   : > { %s148_s3 = sshll.u32 %s139_s30, 4  ;;  %s441_s6 = scalar_lea.hbm %s674_s29, 512  ;;  %s676_s3 = int_to_ptr.vmem [resolvable:$true] %s148_s3 }
  0x29   : > { %s681_s4 = scalar_select %p59_p1, %s545_s11, %s61_s17  }
  0x2a   : > { %p442_p0 = scmp.ne.s32.totalorder %s674_s29, %s441_s6  ;;  %p443_p2 = pneg %p647_p7 }
  0x2b   : > { %s446_s26 = scalar_lea.hbm %s782_s1, 1536  ;;  %p447_p10 = scmp.lt.u32.totalorder %s674_s29, %s782_s1 }
  0x2c   : > { %p444_p4 = pnand %p443_p2, %p442_p0  ;;  %p448_p11 = scmp.lt.u32.totalorder %s446_s26, %s441_s6 }
  0x2d   : > { %p450_p13 = scmp.lt.u32.totalorder %s441_s6, %s674_s29 }
  0x2e   : > { %p445_p6 = pneg %p444_p4  ;;  %p449_p5 = por %p448_p11, %p447_p10 }
  0x30   : > { %p451_p1 = por %p450_p13, %p449_p5 }
  0x32   : > { %p452_p9 = pnand %p451_p1, %p445_p6 }
  0x34   : > { %455 = shalt.err (!%p452_p9)
}
  0x35   : > { %s456_s17 = scalar_lea.vmem %s676_s3, 512  ;;  %s560_s23 = smov [#allocation6]  }
  0x36   : > { %p457_p0 = scmp.ne.s32.totalorder %s676_s3, %s456_s17  ;;  %s461_s27 = sshll.u32 %s560_s23, 4  ;;  %s462_s27 = int_to_ptr.vmem [resolvable:$false] %s461_s27 }
  0x37   : > { %s463_s28 = scalar_lea.vmem %s462_s27, 1024  ;;  %p464_p3 = scmp.lt.s32.totalorder %s676_s3, %s462_s27 }
  0x38   : > { %p459_p4 = pnand %p457_p0, %p443_p2  ;;  %p465_p10 = scmp.lt.s32.totalorder %s463_s28, %s456_s17 }
  0x3a   : > { %p460_p8 = pneg %p459_p4  ;;  %p466_p11 = por %p465_p10, %p464_p3 }
  0x3c   : > { %p467_p5 = pnand %p466_p11, %p460_p8 }
  0x3e   : > { %470 = shalt.err (!%p467_p5)
}
  0x3f   : > { %s561_s30 = smov 128   ;;  %s562_s6 = smov 8  }
  0x40   : > { %366 = dma.hbm_to_vmem [thread:$0]  (!%p647_p7), %s674_s29, 512, %s676_s3, %s683_s5, %s561_s30, %s561_s30, %s562_s6  }
  0x41   : > { %160 = sbr.rel (%p639_p12) target bundleno = 108 (0x6c), region = 28  ;;  %p794_p9 = scmp.ne.s32.totalorder (!%p639_p12), %s788_s18, 0 }
  0x48   : > { %524 = dma.done.wait (%p794_p9), [#allocation5], 16  }
  0x49   : > { %526 = vsyncadd (%p794_p9), [#allocation5], 4294967280  ;;  %s718_s7 = sand.u32 1, %s541_s10   ;;  %p795_p3 = scmp.ne.s32.totalorder %s789_s19, 0 }
  0x4a   : > { %s341_s8 = sshll.u32 %s718_s7, 5  ;;  %s167_s26 = scalar_lea.sflag [#allocation3], %s718_s7 }
  0x4b   : > { %s170_s15 = scalar_lea.vmem [#allocation6], %s341_s8 }
  0x4c   : > { %528 = dma.done.wait (%p795_p3), %s167_s26, 512  }
  0x4d   : > { %530 = vsyncadd (%p795_p3), %s167_s26, 4294966784 }
  0x4e   : > { %175 = sfence }
  0x4f   : > { %s343_s22 = sshll.u32 %s549_s12, 1  ;;  %v198_v0 = vld [vmem:[%s170_s15] sm:$0xff]  ;;  %v199_v1 = vld [vmem:[%s170_s15 + $0x8] sm:$0xff]  ;;  %v200_v2 = vld [vmem:[%s170_s15 + $0x10] sm:$0xff]  ;;  %s191_s3 = scalar_lea.vmem [#allocation7], %s341_s8 }
  0x50   : > { %s195_s18 = sld [smem:[#allocation2 + %s343_s22]]  ;;  %s196_s24 = sadd.s32 1, %s343_s22  ;;  %v201_v3 = vld [vmem:[%s170_s15 + $0x18] sm:$0xff] }
  0x51   : > { %s197_s29 = sld [smem:[#allocation2 + %s196_s24]]  ;;  %s232_s5 = sshll.u32 %s191_s3, 4  ;;  %s728_s5 = int_to_ptr.vmem [resolvable:$true] %s232_s5 }
  0x52   : > { %s350_s19 = sshll.u32 %s549_s12, 9  ;;  %s217_s12 = scalar_lea.sflag [#allocation4], %s718_s7 }
  0x53   : > { %s733_s23 = scalar_lea.hbm %s783_s2, %s350_s19  ;;  %s471_s27 = scalar_lea.vmem %s728_s5, 512 }
  0x54   : > { %p472_p7 = scmp.ne.s32.totalorder %s728_s5, %s471_s27  ;;  %p796_p8 = scmp.ne.s32.totalorder %s790_s20, 0 }
  0x55   : > { %s563_s28 = smov [#allocation7]  }
  0x56   : > { %v202_v4 = vstv %s195_s18  ;;  %p473_p12 = pnand %p472_p7, %p796_p8  ;;  %s475_s30 = sshll.u32 %s563_s28, 4  ;;  %s476_s30 = int_to_ptr.vmem [resolvable:$false] %s475_s30 }
  0x57   : > { %v203_v5 = vsub.f32 %v198_v0, %v202_v4  ;;  %v207_v6 = vstv %s197_s29  ;;  %v204_v7 = vsub.f32 %v199_v1, %v202_v4  ;;  %v205_v8 = vsub.f32 %v200_v2, %v202_v4  ;;  %s477_s6 = scalar_lea.vmem %s476_s30, 1024  ;;  %p478_p6 = scmp.lt.s32.totalorder %s728_s5, %s476_s30 }
  0x58   : > { %v206_v9 = vsub.f32 %v201_v3, %v202_v4  ;;  %p474_p2 = pneg %p473_p12  ;;  %p479_p13 = scmp.lt.s32.totalorder %s477_s6, %s471_s27 }
  0x59   : > { %v208_v10 = vmul.f32 %v207_v6, %v203_v5  ;;  %v209_v11 = vmul.f32 %v207_v6, %v204_v7  ;;  %v210_v12 = vmul.f32 %v207_v6, %v205_v8 }
  0x5a   : > { %v211_v13 = vmul.f32 %v207_v6, %v206_v9  ;;  %p480_p1 = por %p479_p13, %p478_p6 }
  0x5b   : > { %212 = vst [vmem:[%s191_s3] sm:$0xff] %v208_v10  ;;  %213 = vst [vmem:[%s191_s3 + $0x8] sm:$0xff] %v209_v11 }
  0x5c   : > { %214 = vst [vmem:[%s191_s3 + $0x10] sm:$0xff] %v210_v12  ;;  %215 = vst [vmem:[%s191_s3 + $0x18] sm:$0xff] %v211_v13  ;;  %p481_p0 = pnand %p480_p1, %p474_p2 }
  0x5e   : > { %484 = shalt.err (!%p481_p0)
}
  0x5f   : > { %s485_s8 = scalar_lea.hbm %s733_s23, 512  ;;  %s489_s22 = scalar_lea.hbm %s783_s2, 1536 }
  0x60   : > { %p486_p4 = scmp.ne.s32.totalorder %s733_s23, %s485_s8  ;;  %p490_p5 = scmp.lt.u32.totalorder %s733_s23, %s783_s2 }
  0x61   : > { %p491_p9 = scmp.lt.u32.totalorder %s489_s22, %s485_s8  ;;  %p493_p7 = scmp.lt.u32.totalorder %s485_s8, %s733_s23 }
  0x62   : > { %p487_p10 = pnand %p486_p4, %p796_p8 }
  0x63   : > { %p492_p3 = por %p491_p9, %p490_p5 }
  0x64   : > { %p488_p11 = pneg %p487_p10 }
  0x65   : > { %p494_p12 = por %p493_p7, %p492_p3 }
  0x67   : > { %p495_p2 = pnand %p494_p12, %p488_p11 }
  0x69   : > { %498 = shalt.err (!%p495_p2)
}
  0x6a   : > { %s564_s29 = smov 128   ;;  %s565_s3 = smov 8  }
  0x6b   : > { %357 = dma.vmem_to_hbm [thread:$0]  (%p796_p8), %s728_s5, 512, %s733_s23, %s217_s12, %s564_s29, %s564_s29, %s565_s3  }
  0x6c PF: > { %p374_p6 = scmp.ge.s32.totalorder %s557_s14, 2  ;;  %s247_s19 = sand.u32 1, %s537_s9  }
  0x6d   : > { %p797_p13 = scmp.ne.s32.totalorder %s791_s21, 0  ;;  %s248_s16 = scalar_lea.sflag [#allocation4], %s247_s19 }
  0x6f   : > { %p368_p1 = pnand %p374_p6, %p797_p13 }
  0x71   : > { %532 = dma.done.wait (!%p368_p1), %s248_s16, 512  }
  0x72   : > { %534 = vsyncadd (!%p368_p1), %s248_s16, 4294966784  ;;  %s19_s14 = sadd.s32 1, %s557_s14   ;;  %s798_s9 = smov %s541_s10 }
  0x73   : > { %p16_p0 = scmp.ge.s32.totalorder %s19_s14, 5   ;;  %s799_s10 = smov %s545_s11 }
  0x74   : > { %s800_s11 = smov %s681_s4  ;;  %s801_s12 = smov %s553_s13 }
  0x75   : > { %s802_s13 = smov %s804_s25  ;;  %18 = sbr.rel (!%p16_p0) target bundleno = 7 (0x7), region = 78 }
  0x7c   :  { %253 = vsyncpa [#allocation3], 1 }
  0x7d   :  { %255 = vsyncpa [#allocation3 + $0x1], 1 }
  0x7e   :  { %256 = vsyncpa [#allocation4], 1 }
  0x7f   :  { %258 = vsyncpa [#allocation4 + $0x1], 1 }
  0x80   :  { %259 = vsyncpa [#allocation5], 1 }
  0x81   :  { %261 = vsyncpa [#allocation5 + $0x1], 1 }

</bundles_post_ra>
